<compile_context>
chip_gen: v5e
topology: v5e:2x2
jax: 0.10.0
libtpu: 0.0.40
codegen_flags: <defaults>
</compile_context>

<pallas_src>
import functools

import numpy as np
import jax
import jax.numpy as jnp
from jax import lax
from jax.experimental import pallas as pl
from jax.experimental.pallas import tpu as pltpu


def _round_up(x, m):
    return ((x + m - 1) // m) * m


def _flatten_to_2d(x):
    if x.ndim == 2:
        return x
    if x.ndim == 3:
        # 'b d l -> b (d l)' (row-major reshape == einops rearrange here)
        return x.reshape(x.shape[0], -1)
    raise ValueError(f"x should be 2d or 3d, but got {x.ndim}")


def _hamming_coefs(num_kernel):
    if num_kernel > 1:
        n = np.arange(num_kernel, dtype=np.float64)
        w = 0.54 - 0.46 * np.cos(2.0 * np.pi * n / (num_kernel - 1))
    else:
        w = np.ones(1, dtype=np.float64)
    w = w / w.sum() * num_kernel
    return tuple(float(c) for c in w)


def _vmem_limit_bytes():
    """Generation-aware VMEM limit: 3/4 of physical, capped (v7x: 48 MiB)."""
    phys = 64 * 1024 * 1024                      # conservative fallback (v7x TC)
    try:
        phys = int(pltpu.get_tpu_info().vmem_capacity_bytes)
    except Exception:
        pass
    return int(min(phys * 3 // 4, 112 * 1024 * 1024))


def _pick_tile(B, T_pad, budget_bytes):
    """Largest square pair-plane tile whose double-buffered set fits budget."""
    base = _round_up(B, 16)                      # 16: bf16 sublane packing

    def need(t):
        return (16 * t * T_pad                   # 4 bf16 planes x 2 buffers
                + 16 * t * t                     # ~4 f32 (tile,tile) temporaries
                + 4096 * t                       # padded (tile,1)/(1,tile) vecs
                + (1 << 20))                     # slack

    if need(base) <= budget_bytes:
        return base                              # whole batch in one block
    # Multi-block tiles must be multiples of 128 (lane rule for (1,tile) rows).
    for cand in (1024, 512, 256, 128):
        if cand < base and need(cand) <= budget_bytes:
            return cand
    # TODO(synk): for extremely wide features (T_pad >> 10k) add an inner
    # feature-axis grid dimension instead of dropping below a 128-row tile.
    return min(base, 128)


def _mkmmd_tile_kernel(g2_ref, xi_hi_ref, xi_lo_ref, xj_hi_ref, xj_lo_ref,
                       sqi_ref, sqj_ref, wi_ref, wj_ref, out_ref, *,
                       kernel_mul, num_kernel, coefs, hi_lo_terms):
    """One (tile x tile) block of the weighted RBF-kernel reduction.

    Only the upper-triangular block pairs (j >= i) are evaluated; strictly
    upper blocks are counted twice (K is symmetric).
    """
    i = pl.program_id(0)
    j = pl.program_id(1)

    @pl.when(j >= i)
    def _body():
        @pl.when(j == i)                          # first executed j for row i
        def _init():
            out_ref[...] = jnp.zeros_like(out_ref)

        # Gram block on the MXU: precomputed bf16 hi/lo split, lo*lo dropped.
        dn = (((1,), (1,)), ((), ()))             # contract lane axis (A @ B^T)
        xi_hi = xi_hi_ref[...]
        xj_hi = xj_hi_ref[...]
        gram = lax.dot_general(xi_hi, xj_hi, dn,
                               preferred_element_type=jnp.float32)
        if hi_lo_terms >= 2:
            gram = gram + lax.dot_general(xi_lo_ref[...], xj_hi, dn,
                                          preferred_element_type=jnp.float32)
        if hi_lo_terms >= 3:
            gram = gram + lax.dot_general(xi_hi, xj_lo_ref[...], dn,
                                          preferred_element_type=jnp.float32)

        # Exponent of the widest-bandwidth kernel, all constants pre-folded:
        #   neg = scale * ||xi - xj||^2 = g2*gram + sq_i*scale + sq_j*scale
        # (scale < 0, so clamp at 0 replaces the l2 >= 0 guard).
        neg = jnp.minimum(gram * g2_ref[0, 0] + sqi_ref[...] + sqj_ref[...],
                          0.0)

        if float(kernel_mul) == 2.0:
            # One exp (largest bandwidth), then repeated squaring on the VPU:
            #   exp(x/2^(K-1)) --square--> exp(x/2^(K-2)) --> ... --> exp(x)
            e = jnp.exp(neg)
            c = float(coefs[num_kernel - 1])
            ksum = e if c == 1.0 else c * e
            for k in range(num_kernel - 2, -1, -1):
                e = e * e
                c = float(coefs[k])
                ksum = ksum + (e if c == 1.0 else c * e)
        else:
            ksum = None
            for k in range(num_kernel):
                e = jnp.exp(neg * float(kernel_mul) ** (-k))
                c = float(coefs[k])
                term = e if c == 1.0 else c * e
                ksum = term if ksum is None else ksum + term

        # Fused weighted block means on the MXU:  partial = w_i^T K w_j.
        col = lax.dot_general(ksum, wj_ref[...], (((1,), (1,)), ((), ())),
                              preferred_element_type=jnp.float32)   # (tile, 1)
        partial = lax.dot_general(wi_ref[...], col,
                                  (((1,), (0,)), ((), ())),
                                  preferred_element_type=jnp.float32)  # (1, 1)

        sym = jnp.where(j > i, jnp.float32(2.0), jnp.float32(1.0))
        out_ref[...] += (sym * partial).reshape(1, 1, 1)


def mkmmd_loss(source, target, *, kernel_type="rbf", kernel_mul=2.0,
               num_kernel=5, fix_sigma=None, coefficient="ones",
               hi_lo_terms=3, _force_tile=None):
    """Pallas implementation of _MkMMD_old.forward (returns a scalar f32).

    hi_lo_terms: 3 = full bf16 hi/lo Gram (default), 2 drops one cross term
    (accuracy-gated knob for MXU-bound v5e).
    """
    assert kernel_type == "rbf"
    assert coefficient in {"ones", "auto"}
    assert num_kernel >= 1
    assert hi_lo_terms in (1, 2, 3)

    s2 = _flatten_to_2d(source).astype(jnp.float32)
    t2 = _flatten_to_2d(target).astype(jnp.float32)
    ns, nt = int(s2.shape[0]), int(t2.shape[0])
    total = jnp.concatenate([s2, t2], axis=0)            # (B, T)
    B, T = int(total.shape[0]), int(total.shape[1])

    # Pairwise distances are translation invariant: center once (O(B*T)).
    total_c = total - jnp.mean(total, axis=0, keepdims=True)
    sq = jnp.sum(total_c * total_c, axis=1)              # (B,)

    if fix_sigma is not None:
        bandwidth = jnp.float32(fix_sigma)
    else:
        # sum_ij ||x_i - x_j||^2 = 2*B*sum_i ||x_i - mean||^2  (exact)
        bandwidth = 2.0 * B * jnp.sum(sq) / float(B * B - B)
    base_bw = bandwidth / float(kernel_mul) ** (num_kernel // 2)

    # Hoisted per-element constants.
    if float(kernel_mul) == 2.0:
        scale_eff = -1.0 / (base_bw * (2.0 ** (num_kernel - 1)))
    else:
        scale_eff = -1.0 / base_bw
    g2 = jnp.reshape(-2.0 * scale_eff, (1, 1)).astype(jnp.float32)

    coefs = ((1.0,) * num_kernel if coefficient == "ones"
             else _hamming_coefs(num_kernel))

    # bf16 hi/lo planes, computed once and streamed (no per-tile splits).
    total_hi = total_c.astype(jnp.bfloat16)
    total_lo = (total_c - total_hi.astype(jnp.float32)).astype(jnp.bfloat16)

    # Padding / tiling: lanes to 128, rows to the chosen pair-plane tile.
    T_pad = _round_up(T, 128)
    vmem_limit = _vmem_limit_bytes()
    if _force_tile is not None:
        tile = int(_force_tile)
    else:
        tile = _pick_tile(B, T_pad, (vmem_limit * 3) // 4)
    B_pad = _round_up(B, tile)
    n_blk = B_pad // tile
    # TODO(synk): v7x megacore triangular balance (pair row block i with
    # n_blk-1-i in the index maps) is not applied; i is plain "parallel".

    def pad_rows(x):
        return jnp.pad(x, ((0, B_pad - B), (0, T_pad - T)))

    hi_p = pad_rows(total_hi)
    lo_p = pad_rows(total_lo)
    sq_s = jnp.pad(sq * scale_eff, (0, B_pad - B))        # pre-scaled norms
    w = jnp.concatenate([
        jnp.full((ns,), 1.0 / ns, dtype=jnp.float32),
        jnp.full((nt,), -1.0 / nt, dtype=jnp.float32),
        jnp.zeros((B_pad - B,), dtype=jnp.float32),       # padded rows: w = 0
    ])
    sq_col = sq_s.reshape(B_pad, 1).astype(jnp.float32)
    sq_row = sq_s.reshape(1, B_pad).astype(jnp.float32)
    w_row = w.reshape(1, B_pad)

    kernel = functools.partial(
        _mkmmd_tile_kernel, kernel_mul=float(kernel_mul),
        num_kernel=int(num_kernel), coefs=coefs, hi_lo_terms=int(hi_lo_terms))

    row_blk = lambda i, j: (i, 0)
    col_blk = lambda i, j: (jnp.maximum(i, j), 0)   # clamp: no DMA for skipped
    vec_i = lambda i, j: (0, i)
    vec_j = lambda i, j: (0, jnp.maximum(i, j))

    partials = pl.pallas_call(
        kernel,
        out_shape=jax.ShapeDtypeStruct((n_blk, 1, 1), jnp.float32),
        grid=(n_blk, n_blk),
        in_specs=[
            pl.BlockSpec(memory_space=pltpu.MemorySpace.SMEM),   # g2 (1,1)
            pl.BlockSpec((tile, T_pad), row_blk),                # xi hi plane
            pl.BlockSpec((tile, T_pad), row_blk),                # xi lo plane
            pl.BlockSpec((tile, T_pad), col_blk),                # xj hi plane
            pl.BlockSpec((tile, T_pad), col_blk),                # xj lo plane
            pl.BlockSpec((tile, 1), row_blk),                    # sq*scale col
            pl.BlockSpec((1, tile), vec_j),                      # sq*scale row
            pl.BlockSpec((1, tile), vec_i),                      # weights (i)
            pl.BlockSpec((1, tile), vec_j),                      # weights (j)
        ],
        out_specs=pl.BlockSpec((1, 1, 1), lambda i, j: (i, 0, 0)),
        compiler_params=pltpu.CompilerParams(
            dimension_semantics=("parallel", "arbitrary"),
            vmem_limit_bytes=vmem_limit),
    )(g2, hi_p, lo_p, hi_p, lo_p, sq_col, sq_row, w_row, w_row)

    # TODO(synk): the original module also register_buffer's bandwidth /
    # bandwidth_list; only the scalar loss is returned here.
    return jnp.sum(partials)


def _mkmmd_reference(source, target, kernel_mul=2.0, num_kernel=5,
                     fix_sigma=None, coefs=None):
    """Pure-JAX reference mirroring the PyTorch module (for sanity check)."""
    s2 = _flatten_to_2d(source).astype(jnp.float32)
    t2 = _flatten_to_2d(target).astype(jnp.float32)
    total = jnp.concatenate([s2, t2], axis=0)
    B = total.shape[0]
    diff = total[None, :, :] - total[:, None, :]
    l2 = jnp.sum(diff * diff, axis=2)
    bandwidth = (jnp.float32(fix_sigma) if fix_sigma is not None
                 else jnp.sum(l2) / (B * B - B))
    base_bw = bandwidth / (kernel_mul ** (num_kernel // 2))
    if coefs is None:
        coefs = (1.0,) * num_kernel
    k_sum = sum(c * jnp.exp(-l2 / (base_bw * kernel_mul ** i))
                for i, c in enumerate(coefs))
    ns = s2.shape[0]
    xx = jnp.mean(k_sum[:ns, :ns])
    yy = jnp.mean(k_sum[ns:, ns:])
    xy = jnp.mean(k_sum[:ns, ns:])
    yx = jnp.mean(k_sum[ns:, :ns])
    return xx + yy - xy - yx


if __name__ == "__main__":
    # NOTE: _MkMMD_old has no learnable parameters — only hyperparameters.
    key = jax.random.PRNGKey(0)
    k_s, k_t, k_s2, k_t2 = jax.random.split(key, 4)

    # Test 1: 3-D inputs (batch, D, sequence) -> T = 32; single-block path.
    source = jax.random.normal(k_s, (8, 4, 8), dtype=jnp.float32)
    target = 0.5 * jax.random.normal(k_t, (8, 4, 8), dtype=jnp.float32) + 0.3
    loss = jax.block_until_ready(
        mkmmd_loss(source, target, kernel_mul=2.0, num_kernel=5,
                   fix_sigma=None, coefficient="ones"))
    ref = jax.block_until_ready(_mkmmd_reference(source, target))
    assert np.isfinite(float(loss))
    np.testing.assert_allclose(float(loss), float(ref), rtol=2e-3, atol=5e-4)

    # Test 2: 2-D inputs, multi-block path (symmetry skip + tile doubling,
    # clamped column index maps) with 'auto' Hamming coefficients.
    src2 = jax.random.normal(k_s2, (96, 32), dtype=jnp.float32)
    tgt2 = 0.7 * jax.random.normal(k_t2, (80, 32), dtype=jnp.float32) - 0.2
    loss2 = jax.block_until_ready(
        mkmmd_loss(src2, tgt2, coefficient="auto", _force_tile=128))
    ref2 = jax.block_until_ready(
        _mkmmd_reference(src2, tgt2, coefs=_hamming_coefs(5)))
    assert np.isfinite(float(loss2))
    np.testing.assert_allclose(float(loss2), float(ref2), rtol=2e-3, atol=5e-4)

    print("KERNEL_OK")
</pallas_src>

<mosaic_0001>
module attributes {stable_mosaic.version = 11 : i64} {
  func.func @_mkmmd_tile_kernel(%arg0: i32, %arg1: i32, %arg2: memref<1x1xf32, #tpu.memory_space<smem>>, %arg3: memref<16x128xbf16, #tpu.memory_space<vmem>>, %arg4: memref<16x128xbf16, #tpu.memory_space<vmem>>, %arg5: memref<16x128xbf16, #tpu.memory_space<vmem>>, %arg6: memref<16x128xbf16, #tpu.memory_space<vmem>>, %arg7: memref<16x1xf32, #tpu.memory_space<vmem>>, %arg8: memref<1x16xf32, #tpu.memory_space<vmem>>, %arg9: memref<1x16xf32, #tpu.memory_space<vmem>>, %arg10: memref<1x16xf32, #tpu.memory_space<vmem>>, %arg11: memref<1x1x1xf32, #tpu.memory_space<vmem>>) attributes {dimension_semantics = [#tpu.dimension_semantics<parallel>, #tpu.dimension_semantics<arbitrary>], iteration_bounds = array<i64: 1, 1>, scalar_prefetch = 0 : i64, scratch_operands = 0 : i64, tpu.core_type = #tpu.core_type<tc>, window_params = [{transform_indices = @transform_0, window_bounds = array<i64: 1, 1>}, {transform_indices = @transform_1, window_bounds = array<i64: 16, 128>}, {transform_indices = @transform_2, window_bounds = array<i64: 16, 128>}, {transform_indices = @transform_3, window_bounds = array<i64: 16, 128>}, {transform_indices = @transform_4, window_bounds = array<i64: 16, 128>}, {transform_indices = @transform_5, window_bounds = array<i64: 16, 1>}, {transform_indices = @transform_6, window_bounds = array<i64: 1, 16>}, {transform_indices = @transform_7, window_bounds = array<i64: 1, 16>}, {transform_indices = @transform_8, window_bounds = array<i64: 1, 16>}, {transform_indices = @transform_9, window_bounds = array<i64: 1, 1, 1>}]} {
    %0 = arith.cmpi sge, %arg1, %arg0 : i32
    %1 = arith.extui %0 : i1 to i32
    %c0_i32 = arith.constant 0 : i32
    %2 = arith.cmpi ne, %1, %c0_i32 : i32
    scf.if %2 {
      %3 = arith.cmpi eq, %arg1, %arg0 : i32
      %4 = arith.extui %3 : i1 to i32
      %c0_i32_0 = arith.constant 0 : i32
      %5 = arith.cmpi ne, %4, %c0_i32_0 : i32
      scf.if %5 {
        %cst_31 = arith.constant 0.000000e+00 : f32
        %47 = vector.broadcast %cst_31 : f32 to vector<1x1x1xf32>
        %c0_32 = arith.constant 0 : index
        %c0_33 = arith.constant 0 : index
        %c0_34 = arith.constant 0 : index
        %48 = vector.load %arg11[%c0_32, %c0_33, %c0_34] : memref<1x1x1xf32, #tpu.memory_space<vmem>>, vector<1x1x1xf32>
        tpu.vector_store %arg11[%c0_32, %c0_33, %c0_34], %47 {strides = array<i32>} : memref<1x1x1xf32, #tpu.memory_space<vmem>>, vector<1x1x1xf32>,
      } else {
      }
      %c0 = arith.constant 0 : index
      %c0_1 = arith.constant 0 : index
      %6 = vector.load %arg3[%c0, %c0_1] : memref<16x128xbf16, #tpu.memory_space<vmem>>, vector<16x128xbf16>
      %c0_2 = arith.constant 0 : index
      %c0_3 = arith.constant 0 : index
      %7 = vector.load %arg5[%c0_2, %c0_3] : memref<16x128xbf16, #tpu.memory_space<vmem>>, vector<16x128xbf16>
      %cst = arith.constant dense<0.000000e+00> : vector<16x16xf32>
      %8 = tpu.matmul %6, %7, %cst {dimension_numbers = #tpu.dot_dimension_numbers<[1], [1], [0], [0], [0, 0, 1, 0], [], []>} : vector<16x128xbf16>, vector<16x128xbf16>, vector<16x16xf32> -> vector<16x16xf32>
      %c0_4 = arith.constant 0 : index
      %c0_5 = arith.constant 0 : index
      %9 = vector.load %arg4[%c0_4, %c0_5] : memref<16x128xbf16, #tpu.memory_space<vmem>>, vector<16x128xbf16>
      %cst_6 = arith.constant dense<0.000000e+00> : vector<16x16xf32>
      %10 = tpu.matmul %9, %7, %cst_6 {dimension_numbers = #tpu.dot_dimension_numbers<[1], [1], [0], [0], [0, 0, 1, 0], [], []>} : vector<16x128xbf16>, vector<16x128xbf16>, vector<16x16xf32> -> vector<16x16xf32>
      %11 = arith.addf %8, %10 : vector<16x16xf32>
      %c0_7 = arith.constant 0 : index
      %c0_8 = arith.constant 0 : index
      %12 = vector.load %arg6[%c0_7, %c0_8] : memref<16x128xbf16, #tpu.memory_space<vmem>>, vector<16x128xbf16>
      %cst_9 = arith.constant dense<0.000000e+00> : vector<16x16xf32>
      %13 = tpu.matmul %6, %12, %cst_9 {dimension_numbers = #tpu.dot_dimension_numbers<[1], [1], [0], [0], [0, 0, 1, 0], [], []>} : vector<16x128xbf16>, vector<16x128xbf16>, vector<16x16xf32> -> vector<16x16xf32>
      %14 = arith.addf %11, %13 : vector<16x16xf32>
      %c0_10 = arith.constant 0 : index
      %c0_11 = arith.constant 0 : index
      %15 = memref.load %arg2[%c0_10, %c0_11] : memref<1x1xf32, #tpu.memory_space<smem>>
      %16 = vector.broadcast %15 : f32 to vector<16x16xf32>
      %17 = arith.mulf %14, %16 : vector<16x16xf32>
      %c0_12 = arith.constant 0 : index
      %c0_13 = arith.constant 0 : index
      %18 = vector.load %arg7[%c0_12, %c0_13] : memref<16x1xf32, #tpu.memory_space<vmem>>, vector<16x1xf32>
      %19 = vector.broadcast %18 : vector<16x1xf32> to vector<16x16xf32>
      %20 = arith.addf %17, %19 : vector<16x16xf32>
      %c0_14 = arith.constant 0 : index
      %c0_15 = arith.constant 0 : index
      %21 = vector.load %arg8[%c0_14, %c0_15] : memref<1x16xf32, #tpu.memory_space<vmem>>, vector<1x16xf32>
      %22 = vector.broadcast %21 : vector<1x16xf32> to vector<16x16xf32>
      %23 = arith.addf %20, %22 : vector<16x16xf32>
      %cst_16 = arith.constant 0.000000e+00 : f32
      %24 = vector.broadcast %cst_16 : f32 to vector<16x16xf32>
      %25 = arith.minimumf %23, %24 : vector<16x16xf32>
      %26 = math.exp %25 : vector<16x16xf32>
      %27 = arith.mulf %26, %26 : vector<16x16xf32>
      %28 = arith.addf %26, %27 : vector<16x16xf32>
      %29 = arith.mulf %27, %27 : vector<16x16xf32>
      %30 = arith.addf %28, %29 : vector<16x16xf32>
      %31 = arith.mulf %29, %29 : vector<16x16xf32>
      %32 = arith.addf %30, %31 : vector<16x16xf32>
      %33 = arith.mulf %31, %31 : vector<16x16xf32>
      %34 = arith.addf %32, %33 : vector<16x16xf32>
      %c0_17 = arith.constant 0 : index
      %c0_18 = arith.constant 0 : index
      %35 = vector.load %arg10[%c0_17, %c0_18] : memref<1x16xf32, #tpu.memory_space<vmem>>, vector<1x16xf32>
      %cst_19 = arith.constant dense<0.000000e+00> : vector<16x1xf32>
      %36 = tpu.matmul %34, %35, %cst_19 {dimension_numbers = #tpu.dot_dimension_numbers<[1], [1], [0], [0], [0, 0, 1, 0], [], []>} : vector<16x16xf32>, vector<1x16xf32>, vector<16x1xf32> -> vector<16x1xf32>
      %c0_20 = arith.constant 0 : index
      %c0_21 = arith.constant 0 : index
      %37 = vector.load %arg9[%c0_20, %c0_21] : memref<1x16xf32, #tpu.memory_space<vmem>>, vector<1x16xf32>
      %cst_22 = arith.constant dense<0.000000e+00> : vector<1x1xf32>
      %38 = tpu.matmul %37, %36, %cst_22 {dimension_numbers = #tpu.dot_dimension_numbers<[1], [0], [0], [1], [0, 0, 1, 1], [], []>} : vector<1x16xf32>, vector<16x1xf32>, vector<1x1xf32> -> vector<1x1xf32>
      %39 = arith.cmpi sgt, %arg1, %arg0 : i32
      %cst_23 = arith.constant 2.000000e+00 : f32
      %cst_24 = arith.constant 1.000000e+00 : f32
      %40 = arith.select %39, %cst_23, %cst_24 : f32
      %c0_25 = arith.constant 0 : index
      %c0_26 = arith.constant 0 : index
      %c0_27 = arith.constant 0 : index
      %41 = vector.load %arg11[%c0_25, %c0_26, %c0_27] : memref<1x1x1xf32, #tpu.memory_space<vmem>>, vector<1x1x1xf32>
      %42 = vector.broadcast %40 : f32 to vector<1x1xf32>
      %43 = arith.mulf %42, %38 : vector<1x1xf32>
      %44 = vector.shape_cast %43 : vector<1x1xf32> to vector<1x1x1xf32>
      %45 = arith.addf %41, %44 : vector<1x1x1xf32>
      %c0_28 = arith.constant 0 : index
      %c0_29 = arith.constant 0 : index
      %c0_30 = arith.constant 0 : index
      %46 = vector.load %arg11[%c0_28, %c0_29, %c0_30] : memref<1x1x1xf32, #tpu.memory_space<vmem>>, vector<1x1x1xf32>
      tpu.vector_store %arg11[%c0_28, %c0_29, %c0_30], %45 {strides = array<i32>} : memref<1x1x1xf32, #tpu.memory_space<vmem>>, vector<1x1x1xf32>,
    } else {
    }
    return
  }
  func.func @transform_0(%arg0: i32, %arg1: i32) -> (i32, i32) {
    %c0_i32 = arith.constant 0 : i32
    %c0_i32_0 = arith.constant 0 : i32
    %c0_i32_1 = arith.constant 0 : i32
    return %c0_i32, %c0_i32_0 : i32, i32
  }
  func.func @transform_1(%arg0: i32, %arg1: i32) -> (i32, i32) {
    %c0_i32 = arith.constant 0 : i32
    %c0_i32_0 = arith.constant 0 : i32
    return %arg0, %c0_i32 : i32, i32
  }
  func.func @transform_2(%arg0: i32, %arg1: i32) -> (i32, i32) {
    %c0_i32 = arith.constant 0 : i32
    %c0_i32_0 = arith.constant 0 : i32
    return %arg0, %c0_i32 : i32, i32
  }
  func.func @transform_3(%arg0: i32, %arg1: i32) -> (i32, i32) {
    %0 = arith.maxsi %arg0, %arg1 : i32
    %c0_i32 = arith.constant 0 : i32
    %c0_i32_0 = arith.constant 0 : i32
    return %0, %c0_i32 : i32, i32
  }
  func.func @transform_4(%arg0: i32, %arg1: i32) -> (i32, i32) {
    %0 = arith.maxsi %arg0, %arg1 : i32
    %c0_i32 = arith.constant 0 : i32
    %c0_i32_0 = arith.constant 0 : i32
    return %0, %c0_i32 : i32, i32
  }
  func.func @transform_5(%arg0: i32, %arg1: i32) -> (i32, i32) {
    %c0_i32 = arith.constant 0 : i32
    %c0_i32_0 = arith.constant 0 : i32
    return %arg0, %c0_i32 : i32, i32
  }
  func.func @transform_6(%arg0: i32, %arg1: i32) -> (i32, i32) {
    %0 = arith.maxsi %arg0, %arg1 : i32
    %c0_i32 = arith.constant 0 : i32
    %c0_i32_0 = arith.constant 0 : i32
    return %c0_i32, %0 : i32, i32
  }
  func.func @transform_7(%arg0: i32, %arg1: i32) -> (i32, i32) {
    %c0_i32 = arith.constant 0 : i32
    %c0_i32_0 = arith.constant 0 : i32
    return %c0_i32, %arg0 : i32, i32
  }
  func.func @transform_8(%arg0: i32, %arg1: i32) -> (i32, i32) {
    %0 = arith.maxsi %arg0, %arg1 : i32
    %c0_i32 = arith.constant 0 : i32
    %c0_i32_0 = arith.constant 0 : i32
    return %c0_i32, %0 : i32, i32
  }
  func.func @transform_9(%arg0: i32, %arg1: i32) -> (i32, i32, i32) {
    %c0_i32 = arith.constant 0 : i32
    %c0_i32_0 = arith.constant 0 : i32
    %c0_i32_1 = arith.constant 0 : i32
    return %arg0, %c0_i32, %c0_i32_0 : i32, i32, i32
  }
}

</mosaic_0001>

<bundles_post_ra>
// kernel: tpu_custom_call.1
= control target key start
LH: loop header
LB: loop body
LE: loop exit
PB: predicated region body
PF: predicated region fallthrough
CT: control target
= control target key end

     0   :  { %15 = vsyncpa [#allocation4], 0  ;;  %s467_s0 = inlined_call_operand.<no memory space> [shape: f32[1,1], index: 0, kind: input, shape index: {}]   ;;  %s468_s1 = inlined_call_operand.vmem [shape: bf16[16,128], index: 1, kind: input, shape index: {}]   ;;  %s469_s2 = inlined_call_operand.vmem [shape: bf16[16,128], index: 2, kind: input, shape index: {}]   ;;  %s470_s3 = inlined_call_operand.hbm [shape: bf16[16,128], index: 3, kind: input, shape index: {}]   ;;  %s471_s4 = inlined_call_operand.hbm [shape: bf16[16,128], index: 4, kind: input, shape index: {}]   ;;  %s472_s5 = inlined_call_operand.vmem [shape: f32[16,1], index: 5, kind: input, shape index: {}]   ;;  %s473_s6 = inlined_call_operand.vmem [shape: f32[1,16], index: 6, kind: input, shape index: {}]   ;;  %s474_s7 = inlined_call_operand.vmem [shape: f32[1,16], index: 7, kind: input, shape index: {}]   ;;  %s475_s8 = inlined_call_operand.vmem [shape: f32[1,16], index: 8, kind: input, shape index: {}]   ;;  %s476_s9 = inlined_call_operand.hbm [shape: f32[1,1,1], index: 9, kind: output, shape index: {}]  }
   0x1   :  { %16 = vsyncpa [#allocation7], 0 }
   0x2   :  { %17 = vsyncpa [#allocation5], 0  ;;  %s28_s11 = sshll.u32 %s470_s3, 4  ;;  %s375_s12 = smov [#allocation3]   ;;  %s29_s11 = int_to_ptr.hbm [resolvable:$true] %s28_s11 }
   0x3   :  { %s30_s13 = sshll.u32 %s375_s12, 4  ;;  %s41_s16 = sshll.u32 %s471_s4, 4  ;;  %s31_s13 = int_to_ptr.vmem [resolvable:$true] %s30_s13  ;;  %s42_s16 = int_to_ptr.hbm [resolvable:$true] %s41_s16 }
   0x4   :  { %s376_s17 = smov 64   ;;  %s377_s18 = smov 4  }
   0x5   :  { %36 = dma.hbm_to_vmem [thread:$0]  %s29_s11, 128, %s31_s13, [#allocation4], %s376_s17, %s376_s17, %s377_s18  }
   0x6   :  { %s378_s19 = smov [#allocation6]  }
   0x7   :  { %s43_s20 = sshll.u32 %s378_s19, 4  ;;  %s44_s20 = int_to_ptr.vmem [resolvable:$true] %s43_s20 }
   0x8   :  { %49 = dma.hbm_to_vmem [thread:$0]  %s42_s16, 128, %s44_s20, [#allocation7], %s376_s17, %s376_s17, %s377_s18  }
   0x9   :  { %369 = dma.done.wait [#allocation4], 128  }
   0xa   :  { %370 = vsyncadd [#allocation4], 4294967168 }
   0xb   :  { %371 = dma.done.wait [#allocation7], 128  }
   0xc   :  { %372 = vsyncadd [#allocation7], 4294967168  ;;  %v379_v0 = vmov 0   ;;  %v280_v1 = vld [vmem:[#allocation3] sm:$0xff]  ;;  %v282_v2 = vld [vmem:[#allocation6] sm:$0xff]  ;;  %v154_v12 = vstv %s467_s0  ;;  %vm205_vm0 = vcmask 130048  }
   0xd   :  { %290 = vset.pattern.permute.xlu0 %v379_v0  ;;  %v158_v3 = vld [vmem:[%s472_s5 + $0x8] sm:$0xff]  ;;  %102 = vmatpush.bf16.xpose.msra.mxu0 %v280_v1  ;;  %v281_v4 = vld [vmem:[%s469_s2] sm:$0xff]  ;;  %vm75_vm1 = vcmask 0   ;;  %v380_v54 = vmov 0.0   ;;  %s251_s12 = sshll.u32 %s476_s9, 4  ;;  %s252_s12 = int_to_ptr.hbm [resolvable:$true] %s251_s12 }
   0xe   :  { %122 = vmatpush.bf16.xpose.msra.mxu1 %v280_v1  ;;  %144 = vmatpush.bf16.xpose.msra.mxu2 %v282_v2  ;;  %v279_v5 = vld [vmem:[%s468_s1] sm:$0xff]  ;;  %76 = vst.msk [vmem:[#allocation8] sm:$0x1] %vm75_vm1, %v380_v54 }
   0xf   :  { %166 = vperm.xlu0 %290, %v158_v3   ;;  %v157_v6 = vld [vmem:[%s472_s5] sm:$0xff] }
  0x10   :  { %v291_v15 = vld [vmem:[%s473_s6] ss:$0 sm:$0xff] }
  0x11   :  { %v292_v46 = vld [vmem:[%s475_s8] ss:$0 sm:$0xff]  ;;  %s381_s8 = smov [#allocation8]  }
  0x12   :  { %v212_v56 = vld [vmem:[%s474_s7] sm:$0x1]  ;;  %s249_s30 = sshll.u32 %s381_s8, 4  ;;  %s250_s30 = int_to_ptr.vmem [resolvable:$true] %s249_s30 }
  0x14   :  { %103 = vmatmul.bf16.vlgmr.msra.gmra.mxu0 %v281_v4 }
  0x15   :  { %123 = vmatmul.bf16.vlgmr.msra.gmra.mxu1 %v279_v5  ;;  %145 = vmatmul.bf16.vlgmr.msra.gmra.mxu2 %v279_v5  ;;  %v238_v58 = vld [vmem:[#allocation8] sm:$0x1] }
  0x17   :  { %161 = vperm.xlu0 %290, %v157_v6  }
  0x81   :  { %v167_v7 = vpop.permute.xlu0 %166 }
  0x89   :  { %v162_v14 = vpop.permute.xlu0 %161 }
  0x91   :  { %v104_v8 = vpop.f32.mrf.mxu0 }
  0x92   :  { %v124_v9 = vpop.f32.mrf.mxu1 }
  0x93   :  { %v125_v10 = vadd.f32 %v124_v9, %v104_v8 }
  0x98   :  { %v146_v11 = vpop.f32.mrf.mxu2 }
  0x99   :  { %v151_v13 = vadd.f32 %v146_v11, %v125_v10  ;;  %v106_v17 = vpop.f32.mrf.mxu0 }
  0x9a   :  { %v126_v18 = vpop.f32.mrf.mxu1 }
  0x9b   :  { %v155_v16 = vmul.f32 %v154_v12, %v151_v13  ;;  %v127_v20 = vadd.f32 %v126_v18, %v106_v17 }
  0x9d   :  { %v169_v19 = vadd.f32 %v162_v14, %v155_v16 }
  0x9f   :  { %v175_v21 = vadd.f32 %v291_v15, %v169_v19 }
  0xa0   :  { %v148_v22 = vpop.f32.mrf.mxu2 }
  0xa1   :  { %v177_v23 = vmin.f32 %v175_v21, 0.0  ;;  %v152_v24 = vadd.f32 %v148_v22, %v127_v20 }
  0xa3   :  { %v179_v25 = vmul.f32 1.442695, %v177_v23  ;;  %v156_v26 = vmul.f32 %v154_v12, %v152_v24 }
  0xa5   :  { %v170_v27 = vadd.f32 %v167_v7, %v156_v26  ;;  %293 = vpow2.f32 %v179_v25 }
  0xa7   :  { %v176_v28 = vadd.f32 %v291_v15, %v170_v27 }
  0xa9   :  { %v178_v29 = vmin.f32 %v176_v28, 0.0 }
  0xab   :  { %v181_v30 = vmul.f32 1.442695, %v178_v29  ;;  %v294_v31 = vpop.eup %293 }
  0xac   :  { %v183_v32 = vmul.f32 %v294_v31, %v294_v31 }
  0xad   :  { %295 = vpow2.f32 %v181_v30 }
  0xae   :  { %v185_v35 = vadd.f32 %v294_v31, %v183_v32  ;;  %v187_v36 = vmul.f32 %v183_v32, %v183_v32 }
  0xb0   :  { %v189_v41 = vadd.f32 %v187_v36, %v185_v35  ;;  %v191_v42 = vmul.f32 %v187_v36, %v187_v36 }
  0xb2   :  { %v193_v47 = vadd.f32 %v191_v42, %v189_v41  ;;  %v195_v48 = vmul.f32 %v191_v42, %v191_v42 }
  0xb3   :  { %v296_v33 = vpop.eup %295 }
  0xb4   :  { %v184_v34 = vmul.f32 %v296_v33, %v296_v33  ;;  %v197_v51 = vadd.f32 %v195_v48, %v193_v47 }
  0xb6   :  { %v186_v37 = vadd.f32 %v296_v33, %v184_v34  ;;  %v188_v38 = vmul.f32 %v184_v34, %v184_v34  ;;  %v203_v52 = vmul.f32 %v292_v46, %v197_v51 }
  0xb8   :  { %v190_v39 = vadd.f32 %v188_v38, %v186_v37  ;;  %v192_v40 = vmul.f32 %v188_v38, %v188_v38  ;;  %v206_v53 = vsel %vm205_vm0, %v203_v52, 0.0 }
  0xba   :  { %v194_v43 = vadd.f32 %v192_v40, %v190_v39  ;;  %v196_v44 = vmul.f32 %v192_v40, %v192_v40 }
  0xbc   :  { %v198_v45 = vadd.f32 %v196_v44, %v194_v43 }
  0xbe   :  { %v204_v49 = vmul.f32 %v292_v46, %v198_v45 }
  0xc0   :  { %v209_v50 = vsel %vm205_vm0, %v204_v49, 0.0 }
  0xc1   :  { %210 = vadd.xlane.f32.xlu1 %v209_v50 }
  0xc9   :  { %207 = vadd.xlane.f32.xlu1 %v206_v53 }
 0x134   :  { %v211_v55 = vpop.xlane.xlu1 %210 }
 0x135   :  { %230 = vmatpush.msra.mxu3 %v211_v55 }
 0x13c   :  { %v208_v57 = vpop.xlane.xlu1 %207 }
 0x13d   :  { %231 = vmatpush.msra.mxu3 %v208_v57 }
 0x13e   :  { %278 = vmatmul.msk.f32.vlgmr.msra.gmra.mxu3 %vm205_vm0, %v212_v56 }
 0x1c1   :  { %v233_v59 = vpop.f32.mrf.mxu3 }
 0x1c2   :  { %v241_v60 = vadd.f32 %v238_v58, %v233_v59 }
 0x1c4   :  { %243 = vst.msk [vmem:[#allocation8] sm:$0x1] %vm75_vm1, %v241_v60 }
 0x1c5   :  { %254 = dma.vmem_to_hbm [thread:$0]  %s250_s30, 16, %s252_s12, [#allocation5]  }
 0x1c6   :  { %373 = dma.done.wait [#allocation5], 16  }
 0x1c7   :  { %374 = vsyncadd [#allocation5], 4294967280 }
 0x1c8   :  { %259 = vsyncpa [#allocation4], 1 }
 0x1c9   :  { %260 = vsyncpa [#allocation7], 1 }
 0x1ca   :  { %261 = vsyncpa [#allocation5], 1 }

</bundles_post_ra>
